<compile_context>
chip_gen: v7x
topology: tpu7x:2x2x1
jax: 0.10.0
libtpu: 0.0.40
codegen_flags: <defaults>
</compile_context>

<pallas_src>
import functools

import jax
import jax.numpy as jnp
from jax import lax
from jax.experimental import pallas as pl
from jax.experimental.pallas import tpu as pltpu


def _placeto_mp_kernel(k, x_ref, adj_ref, wnt1_ref, bnt1_ref, wnt2_ref, bnt2_ref,
                       wagg_ref, bagg_ref, out_ref):
    N, emb = x_ref.shape
    two_emb = 2 * emb
    bf16 = jnp.bfloat16
    f32 = jnp.float32

    x = x_ref[...]          # bf16 [N, emb]
    adj = adj_ref[...]      # bf16 [N, N], adj[u, v] = 1 iff edge u -> v

    # node_transform(x); the L2 weight was duplicated on the host to [emb, 2*emb], so
    # self_trans comes out already replicated across both lane halves (no lane concat).
    h0 = jnp.maximum(
        jnp.dot(x, wnt1_ref[...], preferred_element_type=f32) + bnt1_ref[...], 0.0)
    self_trans = (jnp.dot(h0.astype(bf16), wnt2_ref[...], preferred_element_type=f32)
                  + bnt2_ref[...])                                  # f32 [N, 2*emb]

    # Loop-invariant weight loads / bias broadcasts / masks, hoisted out of the
    # unrolled loop (JAX does not CSE broadcast_in_dim).
    w_pre1 = wagg_ref[0]    # blockdiag(fpa.pre.L1,    bpa.pre.L1)    bf16 [2e, 2e]
    w_pre2 = wagg_ref[1]    # blockdiag(fpa.pre.L2,    bpa.pre.L2)
    w_upd1 = wagg_ref[2]    # blockdiag(fpa.update.L1, bpa.update.L1)
    w_upd2 = wagg_ref[3]    # blockdiag(fpa.update.L2, bpa.update.L2)
    b_pre1 = jnp.broadcast_to(bagg_ref[0], (N, two_emb))
    b_pre2 = jnp.broadcast_to(bagg_ref[1], (N, two_emb))
    b_upd1 = jnp.broadcast_to(bagg_ref[2], (N, two_emb))
    b_upd2 = jnp.broadcast_to(bagg_ref[3], (N, two_emb))

    row = lax.broadcasted_iota(jnp.int32, (N, two_emb), 0)
    lane = lax.broadcasted_iota(jnp.int32, (N, two_emb), 1)
    fwd_lane = lane < emb                                       # fpa half | bpa half
    # fpa zeroes the global sink (node N-1), bpa zeroes the source (node 0).
    sink_mask = (row != jnp.where(fwd_lane, N - 1, 0)).astype(f32)

    def packed_fnn(y, w1, b1, w2, b2):
        # bf16 MXU inputs, f32 accumulation; bias/relu epilogue stays f32.
        h = jnp.maximum(jnp.dot(y.astype(bf16), w1, preferred_element_type=f32) + b1, 0.0)
        return jnp.dot(h.astype(bf16), w2, preferred_element_type=f32) + b2

    def body(_, y):
        # msg = relu(FNN_pre(y)) for both directions in one packed matmul chain.
        msg = jnp.maximum(packed_fnn(y, w_pre1, b_pre1, w_pre2, b_pre2), 0.0).astype(bf16)
        # fpa: z[v] = sum over predecessors u of msg[u]  == adj.T @ msg (contract axis 0)
        # bpa (reversed graph): z[u] = sum over successors v of msg[v] == adj @ msg
        # Both run full-width; the right half is picked with a lane select (no XLU shuffle).
        z_fwd = lax.dot_general(adj, msg, (((0,), (0,)), ((), ())),
                                preferred_element_type=f32)
        z_bwd = jnp.dot(adj, msg, preferred_element_type=f32)
        z = jnp.where(fwd_lane, z_fwd, z_bwd)
        h = jnp.maximum(packed_fnn(z, w_upd1, b_upd1, w_upd2, b_upd2), 0.0) * sink_mask
        return self_trans + h

    y = lax.fori_loop(0, k, body, self_trans, unroll=True)

    # Carry already has the [fpa | bpa] output lane layout -> direct store, no concat.
    # TODO(synk): 2*emb = 64 < 128 lanes so this is a masked store; pad to 128 lanes in
    # the wrapper if N grows and writeback becomes measurable.
    out_ref[...] = y.astype(out_ref.dtype)


def pack_params(W, B):
    """Host-side packing of the 10 Linear layers of MP into the kernel layout.

    Input order: 0,1 node_transform L1,L2 | 2,3 fpa.pre | 4,5 fpa.update |
                 6,7 bpa.pre | 8,9 bpa.update.
    """
    emb = W.shape[1]
    zero = jnp.zeros((emb, emb), jnp.float32)

    def blockdiag(wf, wb):
        top = jnp.concatenate([wf, zero], axis=1)
        bot = jnp.concatenate([zero, wb], axis=1)
        return jnp.concatenate([top, bot], axis=0)          # [2*emb, 2*emb]

    wnt1 = W[0]                                              # [emb, emb]
    bnt1 = B[0]                                              # [1, emb]
    wnt2 = jnp.concatenate([W[1], W[1]], axis=1)             # [emb, 2*emb] (duplicated)
    bnt2 = jnp.concatenate([B[1], B[1]], axis=1)             # [1, 2*emb]
    wagg = jnp.stack([blockdiag(W[2], W[6]), blockdiag(W[3], W[7]),
                      blockdiag(W[4], W[8]), blockdiag(W[5], W[9])])   # [4, 2e, 2e]
    bagg = jnp.stack([jnp.concatenate([B[2], B[6]], 1), jnp.concatenate([B[3], B[7]], 1),
                      jnp.concatenate([B[4], B[8]], 1), jnp.concatenate([B[5], B[9]], 1)])
    return wnt1, bnt1, wnt2, bnt2, wagg, bagg


def placeto_embedding(x, adj, W, B, k):
    """x: [G, N, emb] node features for G graphs; adj: [G, N, N] dense adjacency.

    W: [10, emb, emb] stacked Linear weights, B: [10, 1, emb] stacked biases.
    Returns [G, N, 2*emb] = concat([y_fpa, y_bpa], axis=-1) per graph.
    """
    G, N, emb = x.shape
    wnt1, bnt1, wnt2, bnt2, wagg, bagg = pack_params(W, B)

    bf = jnp.bfloat16
    inputs = (
        x.astype(bf), adj.astype(bf),
        wnt1.astype(bf), bnt1.astype(jnp.float32),
        wnt2.astype(bf), bnt2.astype(jnp.float32),
        wagg.astype(bf), bagg.astype(jnp.float32),
    )
    in_specs = [
        pl.BlockSpec((None, N, emb), lambda g: (g, 0, 0)),          # per-graph x
        pl.BlockSpec((None, N, N), lambda g: (g, 0, 0)),            # per-graph adj
        pl.BlockSpec((emb, emb), lambda g: (0, 0)),                 # shared weights stay
        pl.BlockSpec((1, emb), lambda g: (0, 0)),                   # resident across the
        pl.BlockSpec((emb, 2 * emb), lambda g: (0, 0)),             # grid (constant block
        pl.BlockSpec((1, 2 * emb), lambda g: (0, 0)),               # index).
        pl.BlockSpec((4, 2 * emb, 2 * emb), lambda g: (0, 0, 0)),
        pl.BlockSpec((4, 1, 2 * emb), lambda g: (0, 0, 0)),
    ]
    return pl.pallas_call(
        functools.partial(_placeto_mp_kernel, k),
        out_shape=jax.ShapeDtypeStruct((G, N, 2 * emb), jnp.float32),
        grid=(G,),
        in_specs=in_specs,
        out_specs=pl.BlockSpec((None, N, 2 * emb), lambda g: (g, 0, 0)),
        compiler_params=pltpu.CompilerParams(dimension_semantics=("parallel",)),
    )(*inputs)


def init_params(key, emb):
    """Deterministic stacked parameters for the 5 FNNs (2 Linear layers each) of MP."""
    def linear(kk, fan_in, fan_out):
        kw, kb = jax.random.split(kk)
        bound = 1.0 / jnp.sqrt(jnp.float32(fan_in))
        w = jax.random.uniform(kw, (fan_in, fan_out), jnp.float32, -bound, bound)
        b = jax.random.uniform(kb, (1, fan_out), jnp.float32, -bound, bound)
        return w, b

    keys = jax.random.split(key, 10)
    ws, bs = [], []
    for i in range(10):
        w, b = linear(keys[i], emb, emb)
        ws.append(w)
        bs.append(b)
    return jnp.stack(ws, axis=0), jnp.stack(bs, axis=0)      # [10,emb,emb], [10,1,emb]


def reference_mp(x, adj, W, B, k):
    """Pure-JAX f32 reference of MP.forward for a single graph."""
    def fnn(y, i):
        h = jnp.maximum(y @ W[i] + B[i], 0.0)
        return h @ W[i + 1] + B[i + 1]

    self_trans = fnn(x, 0)
    N = x.shape[0]

    def message_pass(pre_i, upd_i, forward, sink):
        y = self_trans
        for _ in range(k):
            msg = jnp.maximum(fnn(y, pre_i), 0.0)
            z = adj.T @ msg if forward else adj @ msg
            h = jnp.maximum(fnn(z, upd_i), 0.0)
            h = h.at[sink, :].set(0.0)
            y = self_trans + h
        return y

    out_f = message_pass(2, 4, True, N - 1)
    out_b = message_pass(6, 8, False, 0)
    return jnp.concatenate([out_f, out_b], axis=1)


if __name__ == "__main__":
    emb_size = 32
    k = 3
    N = 8    # nodes per graph
    G = 4    # graphs per pallas_call (batched to amortize launch overhead)

    key = jax.random.PRNGKey(0)
    kx, ka, kp = jax.random.split(key, 3)

    x = jax.random.normal(kx, (G, N, emb_size), dtype=jnp.float32)

    # Deterministic per-graph DAGs: strict upper-triangular random edges + a chain,
    # so node index order is topological (source = 0, sink = N-1, matching MP's
    # sink indices len(nodes)-1 / 0).
    upper = jnp.triu(jnp.ones((N, N), jnp.float32), 1)
    rand = jax.random.bernoulli(ka, 0.3, (G, N, N)).astype(jnp.float32) * upper
    chain = jnp.zeros((N, N), jnp.float32).at[jnp.arange(N - 1), jnp.arange(1, N)].set(1.0)
    adj = jnp.clip(rand + chain, 0.0, 1.0)

    W, B = init_params(kp, emb_size)

    out = placeto_embedding(x, adj, W, B, k)
    jax.block_until_ready(out)

    assert out.shape == (G, N, 2 * emb_size)
    assert bool(jnp.all(jnp.isfinite(out)))

    # bf16 MXU operands (f32 accumulation) vs. the pure-f32 reference -> loose tolerance.
    ref = jax.vmap(lambda xg, ag: reference_mp(xg, ag, W, B, k))(x, adj)
    assert bool(jnp.allclose(out, ref, atol=0.15, rtol=0.15))

    print("KERNEL_OK")
</pallas_src>

<mosaic_0001>
module attributes {stable_mosaic.version = 11 : i64} {
  func.func @_placeto_mp_kernel(%arg0: i32, %arg1: memref<1x8x32xbf16, #tpu.memory_space<vmem>>, %arg2: memref<1x8x8xbf16, #tpu.memory_space<vmem>>, %arg3: memref<32x32xbf16, #tpu.memory_space<vmem>>, %arg4: memref<1x32xf32, #tpu.memory_space<vmem>>, %arg5: memref<32x64xbf16, #tpu.memory_space<vmem>>, %arg6: memref<1x64xf32, #tpu.memory_space<vmem>>, %arg7: memref<4x64x64xbf16, #tpu.memory_space<vmem>>, %arg8: memref<4x1x64xf32, #tpu.memory_space<vmem>>, %arg9: memref<1x8x64xf32, #tpu.memory_space<vmem>>) attributes {dimension_semantics = [#tpu.dimension_semantics<parallel>], iteration_bounds = array<i64: 4>, scalar_prefetch = 0 : i64, scratch_operands = 0 : i64, tpu.core_type = #tpu.core_type<tc>, window_params = [{transform_indices = @transform_0, window_bounds = array<i64: 1, 8, 32>}, {transform_indices = @transform_1, window_bounds = array<i64: 1, 8, 8>}, {pipeline_mode = #tpu.pipeline_mode<synchronous>, transform_indices = @transform_2, window_bounds = array<i64: 32, 32>}, {pipeline_mode = #tpu.pipeline_mode<synchronous>, transform_indices = @transform_3, window_bounds = array<i64: 1, 32>}, {pipeline_mode = #tpu.pipeline_mode<synchronous>, transform_indices = @transform_4, window_bounds = array<i64: 32, 64>}, {pipeline_mode = #tpu.pipeline_mode<synchronous>, transform_indices = @transform_5, window_bounds = array<i64: 1, 64>}, {pipeline_mode = #tpu.pipeline_mode<synchronous>, transform_indices = @transform_6, window_bounds = array<i64: 4, 64, 64>}, {pipeline_mode = #tpu.pipeline_mode<synchronous>, transform_indices = @transform_7, window_bounds = array<i64: 4, 1, 64>}, {transform_indices = @transform_8, window_bounds = array<i64: 1, 8, 64>}]} {
    %c0 = arith.constant 0 : index
    %c0_0 = arith.constant 0 : index
    %c0_1 = arith.constant 0 : index
    %0 = vector.load %arg1[%c0, %c0_0, %c0_1] : memref<1x8x32xbf16, #tpu.memory_space<vmem>>, vector<1x8x32xbf16>
    %1 = vector.shape_cast %0 : vector<1x8x32xbf16> to vector<8x32xbf16>
    %c0_2 = arith.constant 0 : index
    %c0_3 = arith.constant 0 : index
    %c0_4 = arith.constant 0 : index
    %2 = vector.load %arg2[%c0_2, %c0_3, %c0_4] : memref<1x8x8xbf16, #tpu.memory_space<vmem>>, vector<1x8x8xbf16>
    %3 = vector.shape_cast %2 : vector<1x8x8xbf16> to vector<8x8xbf16>
    %c0_5 = arith.constant 0 : index
    %c0_6 = arith.constant 0 : index
    %4 = vector.load %arg3[%c0_5, %c0_6] : memref<32x32xbf16, #tpu.memory_space<vmem>>, vector<32x32xbf16>
    %cst = arith.constant dense<0.000000e+00> : vector<8x32xf32>
    %5 = tpu.matmul %1, %4, %cst {dimension_numbers = #tpu.dot_dimension_numbers<[1], [0], [0], [1], [0, 0, 1, 1], [], []>} : vector<8x32xbf16>, vector<32x32xbf16>, vector<8x32xf32> -> vector<8x32xf32>
    %c0_7 = arith.constant 0 : index
    %c0_8 = arith.constant 0 : index
    %6 = vector.load %arg4[%c0_7, %c0_8] : memref<1x32xf32, #tpu.memory_space<vmem>>, vector<1x32xf32>
    %7 = vector.broadcast %6 : vector<1x32xf32> to vector<8x32xf32>
    %8 = arith.addf %5, %7 : vector<8x32xf32>
    %cst_9 = arith.constant 0.000000e+00 : f32
    %9 = vector.broadcast %cst_9 : f32 to vector<8x32xf32>
    %10 = arith.maximumf %8, %9 : vector<8x32xf32>
    %11 = arith.truncf %10 : vector<8x32xf32> to vector<8x32xbf16>
    %c0_10 = arith.constant 0 : index
    %c0_11 = arith.constant 0 : index
    %12 = vector.load %arg5[%c0_10, %c0_11] : memref<32x64xbf16, #tpu.memory_space<vmem>>, vector<32x64xbf16>
    %cst_12 = arith.constant dense<0.000000e+00> : vector<8x64xf32>
    %13 = tpu.matmul %11, %12, %cst_12 {dimension_numbers = #tpu.dot_dimension_numbers<[1], [0], [0], [1], [0, 0, 1, 1], [], []>} : vector<8x32xbf16>, vector<32x64xbf16>, vector<8x64xf32> -> vector<8x64xf32>
    %c0_13 = arith.constant 0 : index
    %c0_14 = arith.constant 0 : index
    %14 = vector.load %arg6[%c0_13, %c0_14] : memref<1x64xf32, #tpu.memory_space<vmem>>, vector<1x64xf32>
    %15 = vector.broadcast %14 : vector<1x64xf32> to vector<8x64xf32>
    %16 = arith.addf %13, %15 : vector<8x64xf32>
    %c0_15 = arith.constant 0 : index
    %c0_16 = arith.constant 0 : index
    %c0_17 = arith.constant 0 : index
    %17 = vector.load %arg7[%c0_15, %c0_16, %c0_17] : memref<4x64x64xbf16, #tpu.memory_space<vmem>>, vector<1x64x64xbf16>
    %18 = vector.shape_cast %17 : vector<1x64x64xbf16> to vector<64x64xbf16>
    %c1 = arith.constant 1 : index
    %c0_18 = arith.constant 0 : index
    %c0_19 = arith.constant 0 : index
    %19 = vector.load %arg7[%c1, %c0_18, %c0_19] : memref<4x64x64xbf16, #tpu.memory_space<vmem>>, vector<1x64x64xbf16>
    %20 = vector.shape_cast %19 : vector<1x64x64xbf16> to vector<64x64xbf16>
    %c2 = arith.constant 2 : index
    %c0_20 = arith.constant 0 : index
    %c0_21 = arith.constant 0 : index
    %21 = vector.load %arg7[%c2, %c0_20, %c0_21] : memref<4x64x64xbf16, #tpu.memory_space<vmem>>, vector<1x64x64xbf16>
    %22 = vector.shape_cast %21 : vector<1x64x64xbf16> to vector<64x64xbf16>
    %c3 = arith.constant 3 : index
    %c0_22 = arith.constant 0 : index
    %c0_23 = arith.constant 0 : index
    %23 = vector.load %arg7[%c3, %c0_22, %c0_23] : memref<4x64x64xbf16, #tpu.memory_space<vmem>>, vector<1x64x64xbf16>
    %24 = vector.shape_cast %23 : vector<1x64x64xbf16> to vector<64x64xbf16>
    %c0_24 = arith.constant 0 : index
    %c0_25 = arith.constant 0 : index
    %c0_26 = arith.constant 0 : index
    %25 = vector.load %arg8[%c0_24, %c0_25, %c0_26] : memref<4x1x64xf32, #tpu.memory_space<vmem>>, vector<1x1x64xf32>
    %26 = vector.shape_cast %25 : vector<1x1x64xf32> to vector<1x64xf32>
    %27 = vector.shape_cast %26 : vector<1x64xf32> to vector<1x64xf32>
    %28 = vector.broadcast %27 : vector<1x64xf32> to vector<8x64xf32>
    %c1_27 = arith.constant 1 : index
    %c0_28 = arith.constant 0 : index
    %c0_29 = arith.constant 0 : index
    %29 = vector.load %arg8[%c1_27, %c0_28, %c0_29] : memref<4x1x64xf32, #tpu.memory_space<vmem>>, vector<1x1x64xf32>
    %30 = vector.shape_cast %29 : vector<1x1x64xf32> to vector<1x64xf32>
    %31 = vector.shape_cast %30 : vector<1x64xf32> to vector<1x64xf32>
    %32 = vector.broadcast %31 : vector<1x64xf32> to vector<8x64xf32>
    %c2_30 = arith.constant 2 : index
    %c0_31 = arith.constant 0 : index
    %c0_32 = arith.constant 0 : index
    %33 = vector.load %arg8[%c2_30, %c0_31, %c0_32] : memref<4x1x64xf32, #tpu.memory_space<vmem>>, vector<1x1x64xf32>
    %34 = vector.shape_cast %33 : vector<1x1x64xf32> to vector<1x64xf32>
    %35 = vector.shape_cast %34 : vector<1x64xf32> to vector<1x64xf32>
    %36 = vector.broadcast %35 : vector<1x64xf32> to vector<8x64xf32>
    %c3_33 = arith.constant 3 : index
    %c0_34 = arith.constant 0 : index
    %c0_35 = arith.constant 0 : index
    %37 = vector.load %arg8[%c3_33, %c0_34, %c0_35] : memref<4x1x64xf32, #tpu.memory_space<vmem>>, vector<1x1x64xf32>
    %38 = vector.shape_cast %37 : vector<1x1x64xf32> to vector<1x64xf32>
    %39 = vector.shape_cast %38 : vector<1x64xf32> to vector<1x64xf32>
    %40 = vector.broadcast %39 : vector<1x64xf32> to vector<8x64xf32>
    %41 = tpu.iota {dimensions = array<i32: 0>} : vector<8x64xi32>
    %42 = tpu.iota {dimensions = array<i32: 1>} : vector<8x64xi32>
    %c32_i32 = arith.constant 32 : i32
    %43 = vector.broadcast %c32_i32 : i32 to vector<8x64xi32>
    %44 = arith.cmpi slt, %42, %43 : vector<8x64xi32>
    %c7_i32 = arith.constant 7 : i32
    %c0_i32 = arith.constant 0 : i32
    %45 = vector.broadcast %c7_i32 : i32 to vector<8x64xi32>
    %46 = vector.broadcast %c0_i32 : i32 to vector<8x64xi32>
    %47 = arith.select %44, %45, %46 : vector<8x64xi1>, vector<8x64xi32>
    %48 = arith.cmpi ne, %41, %47 : vector<8x64xi32>
    %49 = arith.extui %48 : vector<8x64xi1> to vector<8x64xi32>
    %50 = arith.sitofp %49 : vector<8x64xi32> to vector<8x64xf32>
    %c0_i32_36 = arith.constant 0 : i32
    %51 = arith.truncf %16 : vector<8x64xf32> to vector<8x64xbf16>
    %cst_37 = arith.constant dense<0.000000e+00> : vector<8x64xf32>
    %52 = tpu.matmul %51, %18, %cst_37 {dimension_numbers = #tpu.dot_dimension_numbers<[1], [0], [0], [1], [0, 0, 1, 1], [], []>} : vector<8x64xbf16>, vector<64x64xbf16>, vector<8x64xf32> -> vector<8x64xf32>
    %53 = arith.addf %52, %28 : vector<8x64xf32>
    %cst_38 = arith.constant 0.000000e+00 : f32
    %54 = vector.broadcast %cst_38 : f32 to vector<8x64xf32>
    %55 = arith.maximumf %53, %54 : vector<8x64xf32>
    %56 = arith.truncf %55 : vector<8x64xf32> to vector<8x64xbf16>
    %cst_39 = arith.constant dense<0.000000e+00> : vector<8x64xf32>
    %57 = tpu.matmul %56, %20, %cst_39 {dimension_numbers = #tpu.dot_dimension_numbers<[1], [0], [0], [1], [0, 0, 1, 1], [], []>} : vector<8x64xbf16>, vector<64x64xbf16>, vector<8x64xf32> -> vector<8x64xf32>
    %58 = arith.addf %57, %32 : vector<8x64xf32>
    %cst_40 = arith.constant 0.000000e+00 : f32
    %59 = vector.broadcast %cst_40 : f32 to vector<8x64xf32>
    %60 = arith.maximumf %58, %59 : vector<8x64xf32>
    %61 = arith.truncf %60 : vector<8x64xf32> to vector<8x64xbf16>
    %cst_41 = arith.constant dense<0.000000e+00> : vector<8x64xf32>
    %62 = tpu.matmul %3, %61, %cst_41 {dimension_numbers = #tpu.dot_dimension_numbers<[0], [0], [1], [1], [0, 1, 1, 1], [], []>} : vector<8x8xbf16>, vector<8x64xbf16>, vector<8x64xf32> -> vector<8x64xf32>
    %cst_42 = arith.constant dense<0.000000e+00> : vector<8x64xf32>
    %63 = tpu.matmul %3, %61, %cst_42 {dimension_numbers = #tpu.dot_dimension_numbers<[1], [0], [0], [1], [0, 0, 1, 1], [], []>} : vector<8x8xbf16>, vector<8x64xbf16>, vector<8x64xf32> -> vector<8x64xf32>
    %64 = arith.select %44, %62, %63 : vector<8x64xi1>, vector<8x64xf32>
    %65 = arith.truncf %64 : vector<8x64xf32> to vector<8x64xbf16>
    %cst_43 = arith.constant dense<0.000000e+00> : vector<8x64xf32>
    %66 = tpu.matmul %65, %22, %cst_43 {dimension_numbers = #tpu.dot_dimension_numbers<[1], [0], [0], [1], [0, 0, 1, 1], [], []>} : vector<8x64xbf16>, vector<64x64xbf16>, vector<8x64xf32> -> vector<8x64xf32>
    %67 = arith.addf %66, %36 : vector<8x64xf32>
    %cst_44 = arith.constant 0.000000e+00 : f32
    %68 = vector.broadcast %cst_44 : f32 to vector<8x64xf32>
    %69 = arith.maximumf %67, %68 : vector<8x64xf32>
    %70 = arith.truncf %69 : vector<8x64xf32> to vector<8x64xbf16>
    %cst_45 = arith.constant dense<0.000000e+00> : vector<8x64xf32>
    %71 = tpu.matmul %70, %24, %cst_45 {dimension_numbers = #tpu.dot_dimension_numbers<[1], [0], [0], [1], [0, 0, 1, 1], [], []>} : vector<8x64xbf16>, vector<64x64xbf16>, vector<8x64xf32> -> vector<8x64xf32>
    %72 = arith.addf %71, %40 : vector<8x64xf32>
    %cst_46 = arith.constant 0.000000e+00 : f32
    %73 = vector.broadcast %cst_46 : f32 to vector<8x64xf32>
    %74 = arith.maximumf %72, %73 : vector<8x64xf32>
    %75 = arith.mulf %74, %50 : vector<8x64xf32>
    %76 = arith.addf %16, %75 : vector<8x64xf32>
    %c1_i32 = arith.constant 1 : i32
    %77 = arith.truncf %76 : vector<8x64xf32> to vector<8x64xbf16>
    %cst_47 = arith.constant dense<0.000000e+00> : vector<8x64xf32>
    %78 = tpu.matmul %77, %18, %cst_47 {dimension_numbers = #tpu.dot_dimension_numbers<[1], [0], [0], [1], [0, 0, 1, 1], [], []>} : vector<8x64xbf16>, vector<64x64xbf16>, vector<8x64xf32> -> vector<8x64xf32>
    %79 = arith.addf %78, %28 : vector<8x64xf32>
    %cst_48 = arith.constant 0.000000e+00 : f32
    %80 = vector.broadcast %cst_48 : f32 to vector<8x64xf32>
    %81 = arith.maximumf %79, %80 : vector<8x64xf32>
    %82 = arith.truncf %81 : vector<8x64xf32> to vector<8x64xbf16>
    %cst_49 = arith.constant dense<0.000000e+00> : vector<8x64xf32>
    %83 = tpu.matmul %82, %20, %cst_49 {dimension_numbers = #tpu.dot_dimension_numbers<[1], [0], [0], [1], [0, 0, 1, 1], [], []>} : vector<8x64xbf16>, vector<64x64xbf16>, vector<8x64xf32> -> vector<8x64xf32>
    %84 = arith.addf %83, %32 : vector<8x64xf32>
    %cst_50 = arith.constant 0.000000e+00 : f32
    %85 = vector.broadcast %cst_50 : f32 to vector<8x64xf32>
    %86 = arith.maximumf %84, %85 : vector<8x64xf32>
    %87 = arith.truncf %86 : vector<8x64xf32> to vector<8x64xbf16>
    %cst_51 = arith.constant dense<0.000000e+00> : vector<8x64xf32>
    %88 = tpu.matmul %3, %87, %cst_51 {dimension_numbers = #tpu.dot_dimension_numbers<[0], [0], [1], [1], [0, 1, 1, 1], [], []>} : vector<8x8xbf16>, vector<8x64xbf16>, vector<8x64xf32> -> vector<8x64xf32>
    %cst_52 = arith.constant dense<0.000000e+00> : vector<8x64xf32>
    %89 = tpu.matmul %3, %87, %cst_52 {dimension_numbers = #tpu.dot_dimension_numbers<[1], [0], [0], [1], [0, 0, 1, 1], [], []>} : vector<8x8xbf16>, vector<8x64xbf16>, vector<8x64xf32> -> vector<8x64xf32>
    %90 = arith.select %44, %88, %89 : vector<8x64xi1>, vector<8x64xf32>
    %91 = arith.truncf %90 : vector<8x64xf32> to vector<8x64xbf16>
    %cst_53 = arith.constant dense<0.000000e+00> : vector<8x64xf32>
    %92 = tpu.matmul %91, %22, %cst_53 {dimension_numbers = #tpu.dot_dimension_numbers<[1], [0], [0], [1], [0, 0, 1, 1], [], []>} : vector<8x64xbf16>, vector<64x64xbf16>, vector<8x64xf32> -> vector<8x64xf32>
    %93 = arith.addf %92, %36 : vector<8x64xf32>
    %cst_54 = arith.constant 0.000000e+00 : f32
    %94 = vector.broadcast %cst_54 : f32 to vector<8x64xf32>
    %95 = arith.maximumf %93, %94 : vector<8x64xf32>
    %96 = arith.truncf %95 : vector<8x64xf32> to vector<8x64xbf16>
    %cst_55 = arith.constant dense<0.000000e+00> : vector<8x64xf32>
    %97 = tpu.matmul %96, %24, %cst_55 {dimension_numbers = #tpu.dot_dimension_numbers<[1], [0], [0], [1], [0, 0, 1, 1], [], []>} : vector<8x64xbf16>, vector<64x64xbf16>, vector<8x64xf32> -> vector<8x64xf32>
    %98 = arith.addf %97, %40 : vector<8x64xf32>
    %cst_56 = arith.constant 0.000000e+00 : f32
    %99 = vector.broadcast %cst_56 : f32 to vector<8x64xf32>
    %100 = arith.maximumf %98, %99 : vector<8x64xf32>
    %101 = arith.mulf %100, %50 : vector<8x64xf32>
    %102 = arith.addf %16, %101 : vector<8x64xf32>
    %c2_i32 = arith.constant 2 : i32
    %103 = arith.truncf %102 : vector<8x64xf32> to vector<8x64xbf16>
    %cst_57 = arith.constant dense<0.000000e+00> : vector<8x64xf32>
    %104 = tpu.matmul %103, %18, %cst_57 {dimension_numbers = #tpu.dot_dimension_numbers<[1], [0], [0], [1], [0, 0, 1, 1], [], []>} : vector<8x64xbf16>, vector<64x64xbf16>, vector<8x64xf32> -> vector<8x64xf32>
    %105 = arith.addf %104, %28 : vector<8x64xf32>
    %cst_58 = arith.constant 0.000000e+00 : f32
    %106 = vector.broadcast %cst_58 : f32 to vector<8x64xf32>
    %107 = arith.maximumf %105, %106 : vector<8x64xf32>
    %108 = arith.truncf %107 : vector<8x64xf32> to vector<8x64xbf16>
    %cst_59 = arith.constant dense<0.000000e+00> : vector<8x64xf32>
    %109 = tpu.matmul %108, %20, %cst_59 {dimension_numbers = #tpu.dot_dimension_numbers<[1], [0], [0], [1], [0, 0, 1, 1], [], []>} : vector<8x64xbf16>, vector<64x64xbf16>, vector<8x64xf32> -> vector<8x64xf32>
    %110 = arith.addf %109, %32 : vector<8x64xf32>
    %cst_60 = arith.constant 0.000000e+00 : f32
    %111 = vector.broadcast %cst_60 : f32 to vector<8x64xf32>
    %112 = arith.maximumf %110, %111 : vector<8x64xf32>
    %113 = arith.truncf %112 : vector<8x64xf32> to vector<8x64xbf16>
    %cst_61 = arith.constant dense<0.000000e+00> : vector<8x64xf32>
    %114 = tpu.matmul %3, %113, %cst_61 {dimension_numbers = #tpu.dot_dimension_numbers<[0], [0], [1], [1], [0, 1, 1, 1], [], []>} : vector<8x8xbf16>, vector<8x64xbf16>, vector<8x64xf32> -> vector<8x64xf32>
    %cst_62 = arith.constant dense<0.000000e+00> : vector<8x64xf32>
    %115 = tpu.matmul %3, %113, %cst_62 {dimension_numbers = #tpu.dot_dimension_numbers<[1], [0], [0], [1], [0, 0, 1, 1], [], []>} : vector<8x8xbf16>, vector<8x64xbf16>, vector<8x64xf32> -> vector<8x64xf32>
    %116 = arith.select %44, %114, %115 : vector<8x64xi1>, vector<8x64xf32>
    %117 = arith.truncf %116 : vector<8x64xf32> to vector<8x64xbf16>
    %cst_63 = arith.constant dense<0.000000e+00> : vector<8x64xf32>
    %118 = tpu.matmul %117, %22, %cst_63 {dimension_numbers = #tpu.dot_dimension_numbers<[1], [0], [0], [1], [0, 0, 1, 1], [], []>} : vector<8x64xbf16>, vector<64x64xbf16>, vector<8x64xf32> -> vector<8x64xf32>
    %119 = arith.addf %118, %36 : vector<8x64xf32>
    %cst_64 = arith.constant 0.000000e+00 : f32
    %120 = vector.broadcast %cst_64 : f32 to vector<8x64xf32>
    %121 = arith.maximumf %119, %120 : vector<8x64xf32>
    %122 = arith.truncf %121 : vector<8x64xf32> to vector<8x64xbf16>
    %cst_65 = arith.constant dense<0.000000e+00> : vector<8x64xf32>
    %123 = tpu.matmul %122, %24, %cst_65 {dimension_numbers = #tpu.dot_dimension_numbers<[1], [0], [0], [1], [0, 0, 1, 1], [], []>} : vector<8x64xbf16>, vector<64x64xbf16>, vector<8x64xf32> -> vector<8x64xf32>
    %124 = arith.addf %123, %40 : vector<8x64xf32>
    %cst_66 = arith.constant 0.000000e+00 : f32
    %125 = vector.broadcast %cst_66 : f32 to vector<8x64xf32>
    %126 = arith.maximumf %124, %125 : vector<8x64xf32>
    %127 = arith.mulf %126, %50 : vector<8x64xf32>
    %128 = arith.addf %16, %127 : vector<8x64xf32>
    %c0_67 = arith.constant 0 : index
    %c0_68 = arith.constant 0 : index
    %c0_69 = arith.constant 0 : index
    %129 = vector.load %arg9[%c0_67, %c0_68, %c0_69] : memref<1x8x64xf32, #tpu.memory_space<vmem>>, vector<1x8x64xf32>
    %130 = vector.shape_cast %129 : vector<1x8x64xf32> to vector<8x64xf32>
    %131 = vector.shape_cast %128 : vector<8x64xf32> to vector<1x8x64xf32>
    tpu.vector_store %arg9[%c0_67, %c0_68, %c0_69], %131 {strides = array<i32>} : memref<1x8x64xf32, #tpu.memory_space<vmem>>, vector<1x8x64xf32>,
    return
  }
  func.func @transform_0(%arg0: i32) -> (i32, i32, i32) {
    %c0_i32 = arith.constant 0 : i32
    %c0_i32_0 = arith.constant 0 : i32
    %c0_i32_1 = arith.constant 0 : i32
    return %arg0, %c0_i32, %c0_i32_0 : i32, i32, i32
  }
  func.func @transform_1(%arg0: i32) -> (i32, i32, i32) {
    %c0_i32 = arith.constant 0 : i32
    %c0_i32_0 = arith.constant 0 : i32
    %c0_i32_1 = arith.constant 0 : i32
    return %arg0, %c0_i32, %c0_i32_0 : i32, i32, i32
  }
  func.func @transform_2(%arg0: i32) -> (i32, i32) {
    %c0_i32 = arith.constant 0 : i32
    %c0_i32_0 = arith.constant 0 : i32
    %c0_i32_1 = arith.constant 0 : i32
    return %c0_i32, %c0_i32_0 : i32, i32
  }
  func.func @transform_3(%arg0: i32) -> (i32, i32) {
    %c0_i32 = arith.constant 0 : i32
    %c0_i32_0 = arith.constant 0 : i32
    %c0_i32_1 = arith.constant 0 : i32
    return %c0_i32, %c0_i32_0 : i32, i32
  }
  func.func @transform_4(%arg0: i32) -> (i32, i32) {
    %c0_i32 = arith.constant 0 : i32
    %c0_i32_0 = arith.constant 0 : i32
    %c0_i32_1 = arith.constant 0 : i32
    return %c0_i32, %c0_i32_0 : i32, i32
  }
  func.func @transform_5(%arg0: i32) -> (i32, i32) {
    %c0_i32 = arith.constant 0 : i32
    %c0_i32_0 = arith.constant 0 : i32
    %c0_i32_1 = arith.constant 0 : i32
    return %c0_i32, %c0_i32_0 : i32, i32
  }
  func.func @transform_6(%arg0: i32) -> (i32, i32, i32) {
    %c0_i32 = arith.constant 0 : i32
    %c0_i32_0 = arith.constant 0 : i32
    %c0_i32_1 = arith.constant 0 : i32
    %c0_i32_2 = arith.constant 0 : i32
    return %c0_i32, %c0_i32_0, %c0_i32_1 : i32, i32, i32
  }
  func.func @transform_7(%arg0: i32) -> (i32, i32, i32) {
    %c0_i32 = arith.constant 0 : i32
    %c0_i32_0 = arith.constant 0 : i32
    %c0_i32_1 = arith.constant 0 : i32
    %c0_i32_2 = arith.constant 0 : i32
    return %c0_i32, %c0_i32_0, %c0_i32_1 : i32, i32, i32
  }
  func.func @transform_8(%arg0: i32) -> (i32, i32, i32) {
    %c0_i32 = arith.constant 0 : i32
    %c0_i32_0 = arith.constant 0 : i32
    %c0_i32_1 = arith.constant 0 : i32
    return %arg0, %c0_i32, %c0_i32_0 : i32, i32, i32
  }
}

</mosaic_0001>

<bundles_post_ra>
// kernel: tpu_custom_call.1
= control target key start
LH: loop header
LB: loop body
LE: loop exit
PB: predicated region body
PF: predicated region fallthrough
CT: control target
= control target key end

     0   :  { %s2978_s0 = inlined_call_operand.hbm [shape: bf16[4,8,32], index: 0, kind: input, shape index: {}]   ;;  %s2979_s1 = inlined_call_operand.hbm [shape: bf16[4,8,8], index: 1, kind: input, shape index: {}]   ;;  %s2980_s2 = inlined_call_operand.hbm [shape: bf16[32,32], index: 2, kind: input, shape index: {}]   ;;  %s2981_s3 = inlined_call_operand.vmem [shape: f32[1,32], index: 3, kind: input, shape index: {}]   ;;  %s2982_s4 = inlined_call_operand.hbm [shape: bf16[32,64], index: 4, kind: input, shape index: {}]   ;;  %s2983_s5 = inlined_call_operand.vmem [shape: f32[1,64], index: 5, kind: input, shape index: {}]   ;;  %s2984_s6 = inlined_call_operand.hbm [shape: bf16[4,64,64], index: 6, kind: input, shape index: {}]   ;;  %s2985_s7 = inlined_call_operand.vmem [shape: f32[4,1,64], index: 7, kind: input, shape index: {}]   ;;  %s2986_s8 = inlined_call_operand.hbm [shape: f32[4,8,64], index: 8, kind: output, shape index: {}]  }
   0x1   :  { %2993 = sst [smem:[#allocation19_spill]] %s2980_s2 }
   0x2   :  { %2994 = sst [smem:[#allocation20_spill]] %s2982_s4 }
   0x3   :  { %2995 = sst [smem:[#allocation21_spill]] %s2984_s6 }
   0x4   :  { %13 = vsyncpa [#allocation3], 0 }
   0x5   :  { %15 = vsyncpa [#allocation3 + $0x1], 0 }
   0x6   :  { %16 = vsyncpa [#allocation6], 0 }
   0x7   :  { %18 = vsyncpa [#allocation6 + $0x1], 0 }
   0x8   :  { %19 = vsyncpa [#allocation9], 0 }
   0x9   :  { %20 = vsyncpa [#allocation4], 0 }
   0xa   :  { %22 = vsyncpa [#allocation4 + $0x1], 0  ;;  %s2404_s27 = smov 0   ;;  %s2406_s28 = smov 0  }
   0xb   :  { %s2408_s29 = smov 0   ;;  %s2410_s30 = smov 0  }
   0xc LB: > { %2996 = sst [smem:[#allocation17_spill]] %s2334_s27  ;;  %s2425_s9 = sadd.s32 4294967295, %s2346_s30   ;;  %s2346_s30 = sphi %s2410_s30, %s3022_s30   ;;  %s2342_s29 = sphi %s2408_s29, %s3021_s29   ;;  %s2338_s28 = sphi %s2406_s28, %s3020_s28   ;;  %s2334_s27 = sphi %s2404_s27, %s3019_s27  }
   0xd   : > { %s1672_s10 = sadd.s32 4294967294, %s2346_s30   ;;  %p48_p0 = scmp.ne.s32.totalorder %s2338_s28, %s2334_s27 }
   0xe   : > { %p2987_p1 = scmp.eq.s32.totalorder %s2425_s9, 0  ;;  %p230_p3 = scmp.eq.s32.totalorder %s1672_s10, 3 }
   0xf   : > { %p1673_p5 = scmp.ge.s32.totalorder %s2346_s30, 1  ;;  %p237_p7 = scmp.lt.s32.totalorder %s2346_s30, 5 }
  0x10   : > { %p2434_p4 = por %p2987_p1, %p48_p0  ;;  %p2439_p6 = por %p230_p3, %p48_p0 }
  0x11   : > { %p2444_p8 = pnand %p1673_p5, %p237_p7  ;;  %s2348_s14 = smov [#allocation7]  }
  0x12   : > { %s2997_s11 = scalar_select %p2434_p4, 1, 0 }
  0x13   : > { %s2998_s12 = scalar_select %p2439_p6, 1, 0 }
  0x14   : > { %s3000_s13 = scalar_select %p2444_p8, 1, 0 }
  0x15   : > { %2999 = sst [smem:[#allocation18_spill]] %s2998_s12  ;;  %s249_s15 = sshll.u32 %s2348_s14, 4  ;;  %s2448_s15 = int_to_ptr.vmem [resolvable:$true] %s249_s15 }
  0x16   : > { %p2035_p9 = pneg %p2444_p8  ;;  %s2349_s17 = smov [#allocation8]  }
  0x17   : > { %s265_s18 = sshll.u32 %s2349_s17, 4  ;;  %s2350_s19 = smov [#allocation10]   ;;  %s2458_s18 = int_to_ptr.vmem [resolvable:$true] %s265_s18 }
  0x18   : > { %p2454_p10 = pnand %p2035_p9, %p2987_p1  ;;  %s2460_s20 = sshll.u32 %s2350_s19, 4  ;;  %s282_s20 = int_to_ptr.vmem [resolvable:$true] %s2460_s20 }
  0x19   : > { %s3002_s2 = sld [smem:[#allocation19_spill]] }
  0x1a   : > { %p2470_p12 = pneg %p2454_p10 }
  0x1f   : > { %s2124_s23 = scalar_lea.hbm %s3002_s2, 256 }
  0x20   : > { %p2125_p11 = scmp.ne.s32.totalorder %s3002_s2, %s2124_s23  ;;  %p2131_p3 = scmp.lt.u32.totalorder %s2124_s23, %s3002_s2 }
  0x22   : > { %p2127_p13 = pnand %p2470_p12, %p2125_p11 }
  0x24   : > { %p2128_p0 = pneg %p2127_p13 }
  0x26   : > { %p2133_p5 = pnand %p2131_p3, %p2128_p0 }
  0x28   : > { %2136 = shalt.err (!%p2133_p5)
}
  0x29   : > { %s2137_s17 = scalar_lea.vmem %s2448_s15, 256  ;;  %p2145_p2 = scmp.lt.s32.totalorder %s2448_s15, %s2448_s15 }
  0x2a   : > { %p2138_p7 = scmp.ne.s32.totalorder %s2448_s15, %s2137_s17  ;;  %p2146_p6 = scmp.lt.s32.totalorder %s2137_s17, %s2137_s17 }
  0x2c   : > { %p2140_p9 = pnand %p2138_p7, %p2470_p12  ;;  %p2147_p11 = por %p2146_p6, %p2145_p2 }
  0x2e   : > { %p2141_p1 = pneg %p2140_p9 }
  0x30   : > { %p2148_p13 = pnand %p2147_p11, %p2141_p1 }
  0x32   : > { %2151 = shalt.err (!%p2148_p13)
}
  0x33   : > { %s2351_s19 = smov 64   ;;  %s2352_s21 = smov 4  }
  0x34   : > { %2038 = dma.hbm_to_vmem [thread:$0]  (!%p2454_p10), %s3002_s2, 256, %s2448_s15, [#allocation6], %s2351_s19, %s2351_s19, %s2352_s21  }
  0x35   : > { %s3004_s4 = sld [smem:[#allocation20_spill]] }
  0x3b   : > { %s2152_s10 = scalar_lea.hbm %s3004_s4, 256 }
  0x3c   : > { %p2153_p1 = scmp.ne.s32.totalorder %s3004_s4, %s2152_s10  ;;  %p2159_p0 = scmp.lt.u32.totalorder %s2152_s10, %s3004_s4 }
  0x3e   : > { %p2155_p2 = pnand %p2153_p1, %p2470_p12 }
  0x40   : > { %p2156_p6 = pneg %p2155_p2 }
  0x42   : > { %p2161_p3 = pnand %p2159_p0, %p2156_p6 }
  0x44   : > { %2164 = shalt.err (!%p2161_p3)
}
  0x45   : > { %s2165_s15 = scalar_lea.vmem %s2458_s18, 256  ;;  %p2173_p11 = scmp.lt.s32.totalorder %s2458_s18, %s2458_s18 }
  0x46   : > { %p2166_p5 = scmp.ne.s32.totalorder %s2458_s18, %s2165_s15  ;;  %p2174_p13 = scmp.lt.s32.totalorder %s2165_s15, %s2165_s15 }
  0x48   : > { %p2168_p7 = pnand %p2166_p5, %p2470_p12  ;;  %p2175_p1 = por %p2174_p13, %p2173_p11 }
  0x4a   : > { %p2169_p9 = pneg %p2168_p7 }
  0x4c   : > { %p2176_p2 = pnand %p2175_p1, %p2169_p9 }
  0x4e   : > { %2179 = shalt.err (!%p2176_p2)
}
  0x4f   : > { %2041 = dma.hbm_to_vmem [thread:$0]  (!%p2454_p10), %s3004_s4, 256, %s2458_s18, [#allocation9], %s2351_s19, %s2351_s19, %s2352_s21  }
  0x50   : > { %s3005_s6 = sld [smem:[#allocation21_spill]] }
  0x56   : > { %s2180_s24 = scalar_lea.hbm %s3005_s6, 2048 }
  0x57   : > { %p2181_p6 = scmp.ne.s32.totalorder %s3005_s6, %s2180_s24  ;;  %p2187_p5 = scmp.lt.u32.totalorder %s2180_s24, %s3005_s6 }
  0x59   : > { %p2183_p0 = pnand %p2181_p6, %p2470_p12 }
  0x5b   : > { %p2184_p3 = pneg %p2183_p0 }
  0x5d   : > { %p2189_p7 = pnand %p2187_p5, %p2184_p3 }
  0x5f   : > { %2192 = shalt.err (!%p2189_p7)
}
  0x60   : > { %s2193_s15 = scalar_lea.vmem %s282_s20, 2048  ;;  %p2201_p1 = scmp.lt.s32.totalorder %s282_s20, %s282_s20 }
  0x61   : > { %p2194_p9 = scmp.ne.s32.totalorder %s282_s20, %s2193_s15  ;;  %p2202_p2 = scmp.lt.s32.totalorder %s2193_s15, %s2193_s15 }
  0x63   : > { %p2196_p11 = pnand %p2194_p9, %p2470_p12  ;;  %p2203_p4 = por %p2202_p2, %p2201_p1 }
  0x65   : > { %p2197_p13 = pneg %p2196_p11 }
  0x67   : > { %p2204_p8 = pnand %p2203_p4, %p2197_p13 }
  0x69   : > { %2207 = shalt.err (!%p2204_p8)
}
  0x6a   : > { %2044 = dma.hbm_to_vmem [thread:$0]  (!%p2454_p10), %s3005_s6, 2048, %s282_s20, [#allocation9], %s2351_s19, %s2351_s19, %s2352_s21  }
  0x6b   : > { %s2543_s26 = sadd.s32 1, %s2346_s30   ;;  %s35_s12 = sadd.s32 1, %s2342_s29 }
  0x6c   : > { %s32_s16 = ssub.s32 %s2346_s30, %s2543_s26  ;;  %p42_p8 = scmp.ne.s32.totalorder %s2342_s29, %s2338_s28 }
  0x6d   : > { %p33_p4 = scmp.eq.s32.totalorder %s32_s16, 0  ;;  %p43_p12 = scmp.eq.s32.totalorder %s2346_s30, 0 }
  0x6e   : > { %p2059_p6 = scmp.lt.s32.totalorder %s2346_s30, 4  ;;  %p3006_p3 = scmp.eq.s32.totalorder %s2425_s9, 3 }
  0x6f   : > { %s2553_s22 = scalar_select %p33_p4, %s2342_s29, %s35_s12  }
  0x70   : > { %p44_p0 = por %p43_p12, %p42_p8  ;;  %p2557_p5 = por %p3006_p3, %p42_p8 }
  0x71   : > { %s298_s24 = sand.u32 1, %s2342_s29   ;;  %s1679_s25 = sshll.u32 %s2346_s30, 6 }
  0x72   : > { %s3007_s23 = scalar_select %p2557_p5, 1, 0 }
  0x73   : > { %s2563_s20 = sshll.u32 %s298_s24, 2  ;;  %s2568_s10 = scalar_lea.hbm %s2978_s0, %s1679_s25 }
  0x74   : > { %s302_s14 = scalar_lea.vmem [#allocation2], %s2563_s20  ;;  %p2571_p10 = pnand %p2059_p6, %p44_p0 }
  0x75   : > { %s309_s17 = sshll.u32 %s302_s14, 4  ;;  %s2580_s16 = scalar_lea.hbm %s2979_s1, %s1679_s25  ;;  %s2575_s17 = int_to_ptr.vmem [resolvable:$true] %s309_s17 }
  0x76   : > { %s299_s12 = scalar_lea.sflag [#allocation3], %s298_s24  ;;  %s2208_s19 = scalar_lea.hbm %s2568_s10, 64 }
  0x77   : > { %p2209_p7 = scmp.ne.s32.totalorder %s2568_s10, %s2208_s19  ;;  %p2210_p9 = pneg %p2571_p10 }
  0x78   : > { %s2213_s2 = scalar_lea.hbm %s2978_s0, 256  ;;  %p2214_p1 = scmp.lt.u32.totalorder %s2568_s10, %s2978_s0 }
  0x79   : > { %p2211_p11 = pnand %p2210_p9, %p2209_p7  ;;  %p2215_p2 = scmp.lt.u32.totalorder %s2213_s2, %s2208_s19 }
  0x7a   : > { %p2217_p8 = scmp.lt.u32.totalorder %s2208_s19, %s2568_s10 }
  0x7b   : > { %p2212_p13 = pneg %p2211_p11  ;;  %p2216_p4 = por %p2215_p2, %p2214_p1 }
  0x7d   : > { %p2218_p12 = por %p2217_p8, %p2216_p4 }
  0x7f   : > { %p2219_p6 = pnand %p2218_p12, %p2212_p13 }
  0x81   : > { %2222 = shalt.err (!%p2219_p6)
}
  0x82   : > { %s2223_s24 = scalar_lea.vmem %s2575_s17, 64  ;;  %s2353_s25 = smov [#allocation2]  }
  0x83   : > { %p2224_p0 = scmp.ne.s32.totalorder %s2575_s17, %s2223_s24  ;;  %s2228_s18 = sshll.u32 %s2353_s25, 4  ;;  %s2229_s18 = int_to_ptr.vmem [resolvable:$false] %s2228_s18 }
  0x84   : > { %s2230_s4 = scalar_lea.vmem %s2229_s18, 128  ;;  %p2231_p11 = scmp.lt.s32.totalorder %s2575_s17, %s2229_s18 }
  0x85   : > { %p2226_p3 = pnand %p2224_p0, %p2210_p9  ;;  %p2232_p1 = scmp.lt.s32.totalorder %s2230_s4, %s2223_s24 }
  0x87   : > { %p2227_p7 = pneg %p2226_p3  ;;  %p2233_p2 = por %p2232_p1, %p2231_p11 }
  0x89   : > { %p2234_p4 = pnand %p2233_p2, %p2227_p7 }
  0x8b   : > { %2237 = shalt.err (!%p2234_p4)
}
  0x8c   : > { %2048 = dma.hbm_to_vmem [thread:$0]  (!%p2571_p10), %s2568_s10, 64, %s2575_s17, %s299_s12  }
  0x8d   : > { %s316_s2 = sand.u32 1, %s2346_s30   ;;  %s320_s6 = scalar_lea.vmem [#allocation5], %s2563_s20 }
  0x8e   : > { %s327_s27 = sshll.u32 %s320_s6, 4  ;;  %s317_s19 = scalar_lea.sflag [#allocation6], %s316_s2  ;;  %s328_s27 = int_to_ptr.vmem [resolvable:$true] %s327_s27 }
  0x8f   : > { %s2238_s21 = scalar_lea.hbm %s2580_s16, 64  ;;  %s2243_s25 = scalar_lea.hbm %s2979_s1, 256 }
  0x90   : > { %p2239_p13 = scmp.ne.s32.totalorder %s2580_s16, %s2238_s21  ;;  %p2244_p6 = scmp.lt.u32.totalorder %s2580_s16, %s2979_s1 }
  0x91   : > { %p2245_p0 = scmp.lt.u32.totalorder %s2243_s25, %s2238_s21  ;;  %p2247_p7 = scmp.lt.u32.totalorder %s2238_s21, %s2580_s16 }
  0x92   : > { %p2241_p8 = pnand %p2239_p13, %p2210_p9 }
  0x93   : > { %p2246_p3 = por %p2245_p0, %p2244_p6 }
  0x94   : > { %p2242_p12 = pneg %p2241_p8 }
  0x95   : > { %p2248_p11 = por %p2247_p7, %p2246_p3 }
  0x97   : > { %p2249_p1 = pnand %p2248_p11, %p2242_p12 }
  0x99   : > { %2252 = shalt.err (!%p2249_p1)
}
  0x9a   : > { %s2253_s20 = scalar_lea.vmem %s328_s27, 64  ;;  %s2354_s10 = smov [#allocation5]  }
  0x9b   : > { %p2254_p2 = scmp.ne.s32.totalorder %s328_s27, %s2253_s20  ;;  %s2258_s17 = sshll.u32 %s2354_s10, 4  ;;  %s2259_s17 = int_to_ptr.vmem [resolvable:$false] %s2258_s17 }
  0x9c   : > { %s2260_s12 = scalar_lea.vmem %s2259_s17, 128  ;;  %p2261_p8 = scmp.lt.s32.totalorder %s328_s27, %s2259_s17 }
  0x9d   : > { %p2256_p4 = pnand %p2254_p2, %p2210_p9  ;;  %p2262_p5 = scmp.lt.s32.totalorder %s2260_s12, %s2253_s20 }
  0x9f   : > { %p2257_p13 = pneg %p2256_p4  ;;  %p2263_p0 = por %p2262_p5, %p2261_p8 }
  0xa1   : > { %p2264_p6 = pnand %p2263_p0, %p2257_p13 }
  0xa3   : > { %2267 = shalt.err (!%p2264_p6)
}
  0xa4   : > { %2051 = dma.hbm_to_vmem [thread:$0]  (!%p2571_p10), %s2580_s16, 64, %s328_s27, %s317_s19  }
  0xa5   : > { %p3009_p12 = scmp.ne.s32.totalorder %s3000_s13, 0 }
  0xa6   : > { %s2631_s2 = sand.u32 (!%p3009_p12), 1, %s2338_s28   ;;  %p3010_p9 = scmp.ne.s32.totalorder (!%p3009_p12), %s2997_s11, 0 }
  0xa7   : > { %336 = sbr.rel (%p3009_p12) target bundleno = 3925 (0xf55), region = 52  ;;  %s1683_s6 = sshll.u32 (!%p3009_p12), %s2631_s2, 2 }
  0xa8   : > { %s339_s21 = scalar_lea.sflag (!%p3009_p12), [#allocation3], %s2631_s2  ;;  %s342_s14 = scalar_lea.vmem (!%p3009_p12), [#allocation2], %s1683_s6 }
  0xae   : > { %2313 = dma.done.wait (%p3010_p9), %s339_s21, 64  }
  0xaf   : > { %2315 = vsyncadd (%p3010_p9), %s339_s21, 4294967232  ;;  %s347_s15 = sand.u32 1, %s2425_s9   ;;  %s2640_s13 = scalar_lea.vmem [#allocation5], %s1683_s6 }
  0xb0   : > { %s348_s16 = scalar_lea.sflag [#allocation6], %s347_s15 }
  0xb1   : > { %2317 = dma.done.wait (%p3010_p9), %s348_s16, 64  }
  0xb2   : > { %2319 = vsyncadd (%p3010_p9), %s348_s16, 4294967232  ;;  %p3011_p5 = scmp.eq.s32.totalorder %s2425_s9, 0 }
  0xb4   : > { %2321 = dma.done.wait (%p3011_p5), [#allocation6], 256   ;;  %p3012_p10 = pmov %p3011_p5 }
  0xb5   : > { %p3013_p3 = pmov %p3011_p5 }
  0xb6   : > { %2323 = vsyncadd (%p3012_p10), [#allocation6], 4294967040 }
  0xb7   : > { %2325 = dma.done.wait (%p3013_p3), [#allocation9], 2304   ;;  %p3014_p7 = pmov %p3013_p3 }
  0xb8   : > { %v2355_v0 = vmov 0.0   ;;  %vm2356_vm0 = vmmov 0   ;;  %v2104_v1 = vld [vmem:[#allocation7] sm:$0xff]   ;;  %v2105_v2 = vld [vmem:[#allocation7 + $0x8] sm:$0xff]   ;;  %vm427_vm1 = vcmask 261120   ;;  %v2106_v4 = vld [vmem:[#allocation8] sm:$0xff]   ;;  %v605_v54 = vlaneseq }
  0xb9   : > { %2327 = vsyncadd (%p3014_p7), [#allocation9], 4294964992  ;;  %1821 = vmatprep.subr.bf16.mxu0 %v2355_v0  ;;  %1825 = vmatprep.mubr.msk.bf16.mxu0 %vm2356_vm0, %v2355_v0  ;;  %v402_v3 = vld [vmem:[%s342_s14] sm:$0xf]  ;;  %v2107_v5 = vld [vmem:[#allocation8 + $0x8] sm:$0xff]   ;;  %vm639_vm2 = vcmask 523264  }
  0xba   : > { %1829 = vmatprep.subr.bf16.mxu1 %v2355_v0  ;;  %1833 = vmatprep.mubr.msk.bf16.mxu1 %vm2356_vm0, %v2355_v0  ;;  %v2667_v6 = vld [vmem:[#allocation10] sm:$0xff]   ;;  %v2670_v7 = vld [vmem:[#allocation10 + $0x8] sm:$0xff]   ;;  %v2674_v8 = vld [vmem:[#allocation10 + $0x10] sm:$0xff]   ;;  %vm774_vm3 = vcmask 1043456   ;;  %vm770_vm4 = vcmask 64512   ;;  %v2771_v55 = vand.u32 127, %v605_v54 }
  0xbb   : > { %1822 = vmatpush3.bf16.msra.mxu0 %v2104_v1  ;;  %1830 = vmatpush3.bf16.msra.mxu1 %v2106_v4  ;;  %v1689_v9 = vld [vmem:[%s2981_s3] ss:$0 sm:$0xff]  ;;  %v2685_v17 = vld [vmem:[#allocation10 + $0x18] sm:$0xff]   ;;  %v2689_v18 = vld [vmem:[#allocation10 + $0x20] sm:$0xff]   ;;  %s1688_s21 = sshll.u32 %s2631_s2, 3  ;;  %s1740_s14 = sshll.u32 %s2425_s9, 7 }
  0xbc   : > { %1823 = vmatprep.subr.bf16.mxu0 %v2355_v0  ;;  %1831 = vmatprep.subr.bf16.mxu1 %v2355_v0  ;;  %v2692_v19 = vld [vmem:[#allocation10 + $0x28] sm:$0xff]   ;;  %v1693_v20 = vld [vmem:[%s2983_s5] ss:$0 sm:$0xff]  ;;  %v2711_v28 = vld [vmem:[#allocation10 + $0x38] sm:$0xff]   ;;  %vm609_vm5 = vcmp.lt.s32.totalorder %v2771_v55, 32  ;;  %s400_s15 = scalar_lea.vmem [#allocation11], %s1688_s21  ;;  %s2934_s27 = scalar_lea.hbm %s2986_s8, %s1740_s14 }
  0xbd   : > { %v2707_v27 = vld [vmem:[#allocation10 + $0x30] sm:$0xff]   ;;  %v2716_v29 = vld [vmem:[%s2640_s13] sm:$0xf]  ;;  %v2737_v48 = vld [vmem:[#allocation10 + $0x40] sm:$0xff]   ;;  %s1551_s16 = sshll.u32 %s400_s15, 4  ;;  %s1538_s19 = scalar_lea.sflag [#allocation4], %s2631_s2  ;;  %s2936_s16 = int_to_ptr.vmem [resolvable:$true] %s1551_s16 }
  0xbe   : > { %754 = vxpose.xlu0.c.b16.start.end [1/1] (short) (narrow) %v2716_v29, 16  ;;  %v2722_v30 = vld [vmem:[%s2985_s7] ss:$0 sm:$0xff]  ;;  %v2731_v38 = vld [vmem:[%s2985_s7 + $0x1] ss:$0 sm:$0xff]  ;;  %v2746_v49 = vld [vmem:[#allocation10 + $0x48] sm:$0xff]  }
  0xbf   : > { %1824 = vmatpush3.bf16.msra.mxu0 %v2105_v2  ;;  %1832 = vmatpush3.bf16.msra.mxu1 %v2107_v5  ;;  %v2754_v50 = vld [vmem:[#allocation10 + $0x50] sm:$0xff]   ;;  %v2759_v51 = vld [vmem:[#allocation10 + $0x58] sm:$0xff]   ;;  %v2763_v52 = vld [vmem:[#allocation10 + $0x60] sm:$0xff]   ;;  %s2268_s9 = scalar_lea.vmem %s2936_s16, 128  ;;  %p3015_p1 = scmp.ne.s32.totalorder %s3007_s23, 0 }
  0xc0   : > { %1837 = vmatprep.subr.bf16.mxu0 %v2355_v0  ;;  %1849 = vmatprep.subr.bf16.mxu1 %v2355_v0  ;;  %v2766_v53 = vld [vmem:[#allocation10 + $0x68] sm:$0xff]   ;;  %v2791_v4 = vld [vmem:[#allocation10 + $0x78] sm:$0xff]   ;;  %v2798_v5 = vld [vmem:[%s2985_s7 + $0x2] ss:$0 sm:$0xff]  ;;  %p2269_p11 = scmp.ne.s32.totalorder %s2936_s16, %s2268_s9  ;;  %s2358_s24 = smov [#allocation11]  }
  0xc1   : > { %s2272_s25 = sshll.u32 %s2358_s24, 4  ;;  %s2273_s25 = int_to_ptr.vmem [resolvable:$false] %s2272_s25 }
  0xc2   : > { %1826 = vmatmul.mubr.msk.bf16.vlgmr.msra.gmra.mrb[0].mxu0 %vm427_vm1, %v402_v3  ;;  %v2787_v3 = vld [vmem:[#allocation10 + $0x70] sm:$0xff]   ;;  %p2270_p2 = pnand %p2269_p11, %p3015_p1  ;;  %s2274_s18 = scalar_lea.vmem %s2273_s25, 256 }
  0xc3   : > { %1845 = vmatprep.mubr.msk.bf16.mxu0 %vm2356_vm0, %v2355_v0  ;;  %1838 = vmatpush3.bf16.msra.mxu0 %v2667_v6  ;;  %p2275_p13 = scmp.lt.s32.totalorder %s2936_s16, %s2273_s25  ;;  %p2276_p8 = scmp.lt.s32.totalorder %s2274_s18, %s2268_s9 }
  0xc4   : > { %1839 = vmatprep.subr.bf16.mxu0 %v2355_v0  ;;  %p2271_p4 = pneg %p2270_p2 }
  0xc5   : > { %p2277_p0 = por %p2276_p8, %p2275_p13 }
  0xc7   : > { %1840 = vmatpush3.bf16.msra.mxu0 %v2670_v7  ;;  %p2278_p6 = pnand %p2277_p0, %p2271_p4 }
  0xc8   : > { %1841 = vmatprep.subr.bf16.mxu0 %v2355_v0 }
  0xcb   : > { %1842 = vmatpush3.bf16.msra.mxu0 %v2674_v8 }
  0xcc   : > { %1843 = vmatprep.subr.bf16.mxu0 %v2355_v0 }
  0xcf   : > { %1844 = vmatpush3.bf16.msra.mxu0 %v2685_v17 }
  0xd0   : > { %1861 = vmatprep.subr.bf16.mxu0 %v2355_v0 }
 0x124   : > { %v2735_v47 = vpop.trf.xlu0 }
 0x195   : > { %v465_v10 = vpop.f32.mrb[0].mxu0 }
 0x196   : > { %v466_v11 = vadd.f32 %v1689_v9, %v465_v10  ;;  %v1827_v12 = vpop.f32.mrb[1].mxu0 }
 0x197   : > { %v468_v13 = vpop.f32.mrb[2].mxu0 }
 0x198   : > { %v471_v14 = vmax.f32 %v466_v11, 0.0  ;;  %v1828_v15 = vpop.f32.mrb[3].mxu0 }
 0x19a   : > { %v472_v16 = vpack.c.bf16 %v471_v14, %v471_v14 }
 0x19c   : > { %1834 = vmatmul.mubr.msk.bf16.vlgmr.msra.gmra.mrb[0].mxu1 %vm427_vm1, %v472_v16  ;;  %v606_v16 = vshrl.u32 %v605_v54, 7 }
 0x19d   : > { %1857 = vmatprep.mubr.msk.bf16.mxu1 %vm2356_vm0, %v2355_v0  ;;  %1850 = vmatpush3.bf16.msra.mxu1 %v2689_v18 }
 0x19e   : > { %1851 = vmatprep.subr.bf16.mxu1 %v2355_v0 }
 0x1a1   : > { %1852 = vmatpush3.bf16.msra.mxu1 %v2692_v19 }
 0x1a2   : > { %1853 = vmatprep.subr.bf16.mxu1 %v2355_v0 }
 0x1a5   : > { %1854 = vmatpush3.bf16.msra.mxu1 %v2707_v27 }
 0x1a6   : > { %1855 = vmatprep.subr.bf16.mxu1 %v2355_v0 }
 0x1a9   : > { %1856 = vmatpush3.bf16.msra.mxu1 %v2711_v28 }
 0x1aa   : > { %1867 = vmatprep.subr.bf16.mxu1 %v2355_v0 }
 0x26f   : > { %v533_v21 = vpop.f32.mrb[0].mxu1 }
 0x270   : > { %v2700_v22 = vadd.f32 %v1693_v20, %v533_v21  ;;  %v1835_v23 = vpop.f32.mrb[1].mxu1  ;;  %v2357_v20 = vmov 0  }
 0x271   : > { %v536_v24 = vpop.f32.mrb[2].mxu1  ;;  %v610_v21 = vsel %vm609_vm5, 7, %v2357_v20  ;;  %v2817_v23 = vld [vmem:[%s2985_s7 + $0x3] ss:$0 sm:$0xff] }
 0x272   : > { %v614_v25 = vpack.c.bf16 %v2700_v22, %v2700_v22  ;;  %v1836_v26 = vpop.f32.mrb[3].mxu1  ;;  %vm611_vm6 = vcmp.ne.s32.totalorder %v606_v16, %v610_v21 }
 0x274   : > { %1846 = vmatmul.mubr.msk.bf16.vlgmr.msra.gmra.mrb[4].mxu0 %vm639_vm2, %v614_v25 }
 0x275   : > { %1863 = vmatprep.mubr.msk.bf16.mxu0 %vm2356_vm0, %v2355_v0 }
 0x347   : > { %v677_v31 = vpop.f32.mrb[4].mxu0 }
 0x348   : > { %v678_v32 = vadd.f32 %v2722_v30, %v677_v31  ;;  %v1847_v33 = vpop.f32.mrb[5].mxu0  ;;  %v2821_v31 = vsel %vm611_vm6, 1.0, %v2355_v0 }
 0x349   : > { %v680_v34 = vpop.f32.mrb[6].mxu0 }
 0x34a   : > { %v683_v35 = vmax.f32 %v678_v32, 0.0  ;;  %v1848_v36 = vpop.f32.mrb[7].mxu0 }
 0x34c   : > { %v684_v37 = vpack.c.bf16 %v683_v35, %v683_v35 }
 0x34e   : > { %1858 = vmatmul.mubr.msk.bf16.vlgmr.msra.gmra.mrb[4].mxu1 %vm639_vm2, %v684_v37 }
 0x34f   : > { %1869 = vmatprep.mubr.msk.bf16.mxu1 %vm2356_vm0, %v2355_v0 }
 0x421   : > { %v746_v39 = vpop.f32.mrb[4].mxu1 }
 0x422   : > { %v747_v40 = vadd.f32 %v2731_v38, %v746_v39  ;;  %v1859_v41 = vpop.f32.mrb[5].mxu1 }
 0x423   : > { %v749_v42 = vpop.f32.mrb[6].mxu1 }
 0x424   : > { %v752_v43 = vmax.f32 %v747_v40, 0.0  ;;  %v1860_v44 = vpop.f32.mrb[7].mxu1 }
 0x426   : > { %v753_v45 = vpack.c.bf16 %v752_v43, %v752_v43 }
 0x428   : > { %v776_v46 = vsel %vm774_vm3, %v753_v45, 0 }
 0x429   : > { %1862 = vmatpush3.bf16.msra.mxu0 %v776_v46  ;;  %1868 = vmatpush3.bf16.msra.mxu1 %v776_v46 }
 0x42a   : > { %1873 = vmatprep.subr.bf16.mxu0 %v2355_v0  ;;  %1885 = vmatprep.subr.bf16.mxu1 %v2355_v0 }
 0x42c   : > { %1864 = vmatmul.mubr.msk.bf16.vlgmr.msra.gmra.mrb[8].mxu0 %vm770_vm4, %v2735_v47  ;;  %1870 = vmatmul.mubr.msk.bf16.vlgmr.msra.gmra.mrb[8].mxu1 %vm770_vm4, %v2716_v29 }
 0x42d   : > { %1874 = vmatpush3.bf16.msra.mxu0 %v2737_v48  ;;  %1881 = vmatprep.mubr.msk.bf16.mxu0 %vm2356_vm0, %v2355_v0 }
 0x42e   : > { %1875 = vmatprep.subr.bf16.mxu0 %v2355_v0  ;;  %1893 = vmatprep.mubr.msk.bf16.mxu1 %vm2356_vm0, %v2355_v0 }
 0x42f   : > { %1886 = vmatpush3.bf16.msra.mxu1 %v2763_v52 }
 0x430   : > { %1887 = vmatprep.subr.bf16.mxu1 %v2355_v0 }
 0x431   : > { %1876 = vmatpush3.bf16.msra.mxu0 %v2746_v49 }
 0x432   : > { %1877 = vmatprep.subr.bf16.mxu0 %v2355_v0 }
 0x433   : > { %1888 = vmatpush3.bf16.msra.mxu1 %v2766_v53 }
 0x434   : > { %1889 = vmatprep.subr.bf16.mxu1 %v2355_v0 }
 0x435   : > { %1878 = vmatpush3.bf16.msra.mxu0 %v2754_v50 }
 0x436   : > { %1879 = vmatprep.subr.bf16.mxu0 %v2355_v0 }
 0x437   : > { %1890 = vmatpush3.bf16.msra.mxu1 %v2787_v3 }
 0x438   : > { %1891 = vmatprep.subr.bf16.mxu1 %v2355_v0 }
 0x439   : > { %1880 = vmatpush3.bf16.msra.mxu0 %v2759_v51 }
 0x43a   : > { %1897 = vmatprep.subr.bf16.mxu0 %v2355_v0 }
 0x43b   : > { %1892 = vmatpush3.bf16.msra.mxu1 %v2791_v4 }
 0x43c   : > { %1909 = vmatprep.subr.bf16.mxu1 %v2355_v0 }
 0x4ff   : > { %v812_v56 = vpop.f32.mrb[8].mxu0  ;;  %v855_v57 = vpop.f32.mrb[8].mxu1 }
 0x500   : > { %v861_v58 = vsel %vm609_vm5, %v812_v56, %v855_v57  ;;  %v1865_v59 = vpop.f32.mrb[9].mxu0  ;;  %v1871_v60 = vpop.f32.mrb[9].mxu1 }
 0x501   : > { %v862_v61 = vpack.c.bf16 %v861_v58, %v861_v58  ;;  %v815_v62 = vpop.f32.mrb[10].mxu0  ;;  %v858_v63 = vpop.f32.mrb[10].mxu1 }
 0x502   : > { %v1866_v1 = vpop.f32.mrb[11].mxu0  ;;  %v1872_v2 = vpop.f32.mrb[11].mxu1 }
 0x503   : > { %1882 = vmatmul.mubr.msk.bf16.vlgmr.msra.gmra.mrb[12].mxu0 %vm639_vm2, %v862_v61 }
 0x504   : > { %1898 = vmatpush3.bf16.msra.mxu0 %v2667_v6  ;;  %1905 = vmatprep.mubr.msk.bf16.mxu0 %vm2356_vm0, %v2355_v0 }
 0x505   : > { %1899 = vmatprep.subr.bf16.mxu0 %v2355_v0 }
 0x508   : > { %1900 = vmatpush3.bf16.msra.mxu0 %v2670_v7 }
 0x509   : > { %1901 = vmatprep.subr.bf16.mxu0 %v2355_v0 }
 0x50c   : > { %1902 = vmatpush3.bf16.msra.mxu0 %v2674_v8 }
 0x50d   : > { %1903 = vmatprep.subr.bf16.mxu0 %v2355_v0 }
 0x510   : > { %1904 = vmatpush3.bf16.msra.mxu0 %v2685_v17 }
 0x511   : > { %1921 = vmatprep.subr.bf16.mxu0 %v2355_v0 }
 0x5d6   : > { %v924_v9 = vpop.f32.mrb[12].mxu0 }
 0x5d7   : > { %v925_v10 = vadd.f32 %v2798_v5, %v924_v9  ;;  %v1883_v11 = vpop.f32.mrb[13].mxu0 }
 0x5d8   : > { %v927_v12 = vpop.f32.mrb[14].mxu0 }
 0x5d9   : > { %v930_v13 = vmax.f32 %v925_v10, 0.0  ;;  %v1884_v14 = vpop.f32.mrb[15].mxu0 }
 0x5db   : > { %v931_v15 = vpack.c.bf16 %v930_v13, %v930_v13 }
 0x5dd   : > { %1894 = vmatmul.mubr.msk.bf16.vlgmr.msra.gmra.mrb[12].mxu1 %vm639_vm2, %v931_v15 }
 0x5de   : > { %1910 = vmatpush3.bf16.msra.mxu1 %v2689_v18  ;;  %1917 = vmatprep.mubr.msk.bf16.mxu1 %vm2356_vm0, %v2355_v0 }
 0x5df   : > { %1911 = vmatprep.subr.bf16.mxu1 %v2355_v0 }
 0x5e2   : > { %1912 = vmatpush3.bf16.msra.mxu1 %v2692_v19 }
 0x5e3   : > { %1913 = vmatprep.subr.bf16.mxu1 %v2355_v0 }
 0x5e6   : > { %1914 = vmatpush3.bf16.msra.mxu1 %v2707_v27 }
 0x5e7   : > { %1915 = vmatprep.subr.bf16.mxu1 %v2355_v0 }
 0x5ea   : > { %1916 = vmatpush3.bf16.msra.mxu1 %v2711_v28 }
 0x5eb   : > { %1927 = vmatprep.subr.bf16.mxu1 %v2355_v0 }
 0x6b0   : > { %v993_v24 = vpop.f32.mrb[12].mxu1 }
 0x6b1   : > { %v994_v25 = vadd.f32 %v2817_v23, %v993_v24  ;;  %v1895_v26 = vpop.f32.mrb[13].mxu1 }
 0x6b2   : > { %v996_v32 = vpop.f32.mrb[14].mxu1 }
 0x6b3   : > { %v999_v33 = vmax.f32 %v994_v25, 0.0  ;;  %v1896_v34 = vpop.f32.mrb[15].mxu1 }
 0x6b5   : > { %v1000_v35 = vmul.f32 %v2821_v31, %v999_v33 }
 0x6b7   : > { %v1001_v36 = vadd.f32 %v1000_v35, %v2700_v22 }
 0x6b9   : > { %v1002_v37 = vpack.c.bf16 %v1001_v36, %v1001_v36 }
 0x6bb   : > { %1906 = vmatmul.mubr.msk.bf16.vlgmr.msra.gmra.mrb[16].mxu0 %vm639_vm2, %v1002_v37 }
 0x6bc   : > { %1923 = vmatprep.mubr.msk.bf16.mxu0 %vm2356_vm0, %v2355_v0 }
 0x78e   : > { %v1040_v39 = vpop.f32.mrb[16].mxu0 }
 0x78f   : > { %v1041_v40 = vadd.f32 %v2722_v30, %v1040_v39  ;;  %v1907_v41 = vpop.f32.mrb[17].mxu0 }
 0x790   : > { %v1043_v42 = vpop.f32.mrb[18].mxu0 }
 0x791   : > { %v1046_v43 = vmax.f32 %v1041_v40, 0.0  ;;  %v1908_v44 = vpop.f32.mrb[19].mxu0 }
 0x793   : > { %v1047_v45 = vpack.c.bf16 %v1046_v43, %v1046_v43 }
 0x795   : > { %1918 = vmatmul.mubr.msk.bf16.vlgmr.msra.gmra.mrb[16].mxu1 %vm639_vm2, %v1047_v45 }
 0x796   : > { %1929 = vmatprep.mubr.msk.bf16.mxu1 %vm2356_vm0, %v2355_v0 }
 0x868   : > { %v1085_v46 = vpop.f32.mrb[16].mxu1 }
 0x869   : > { %v1086_v54 = vadd.f32 %v2731_v38, %v1085_v46  ;;  %v1919_v56 = vpop.f32.mrb[17].mxu1 }
 0x86a   : > { %v1088_v57 = vpop.f32.mrb[18].mxu1 }
 0x86b   : > { %v1091_v58 = vmax.f32 %v1086_v54, 0.0  ;;  %v1920_v59 = vpop.f32.mrb[19].mxu1 }
 0x86d   : > { %v1092_v60 = vpack.c.bf16 %v1091_v58, %v1091_v58 }
 0x86f   : > { %v1094_v61 = vsel %vm774_vm3, %v1092_v60, 0 }
 0x870   : > { %1922 = vmatpush3.bf16.msra.mxu0 %v1094_v61  ;;  %1928 = vmatpush3.bf16.msra.mxu1 %v1094_v61 }
 0x871   : > { %1933 = vmatprep.subr.bf16.mxu0 %v2355_v0  ;;  %1945 = vmatprep.subr.bf16.mxu1 %v2355_v0 }
 0x873   : > { %1924 = vmatmul.mubr.msk.bf16.vlgmr.msra.gmra.mrb[20].mxu0 %vm770_vm4, %v2735_v47  ;;  %1930 = vmatmul.mubr.msk.bf16.vlgmr.msra.gmra.mrb[20].mxu1 %vm770_vm4, %v2716_v29 }
 0x874   : > { %1934 = vmatpush3.bf16.msra.mxu0 %v2737_v48  ;;  %1941 = vmatprep.mubr.msk.bf16.mxu0 %vm2356_vm0, %v2355_v0 }
 0x875   : > { %1935 = vmatprep.subr.bf16.mxu0 %v2355_v0  ;;  %1946 = vmatpush3.bf16.msra.mxu1 %v2763_v52 }
 0x876   : > { %1947 = vmatprep.subr.bf16.mxu1 %v2355_v0  ;;  %1953 = vmatprep.mubr.msk.bf16.mxu1 %vm2356_vm0, %v2355_v0 }
 0x878   : > { %1936 = vmatpush3.bf16.msra.mxu0 %v2746_v49 }
 0x879   : > { %1937 = vmatprep.subr.bf16.mxu0 %v2355_v0  ;;  %1948 = vmatpush3.bf16.msra.mxu1 %v2766_v53 }
 0x87a   : > { %1949 = vmatprep.subr.bf16.mxu1 %v2355_v0 }
 0x87c   : > { %1938 = vmatpush3.bf16.msra.mxu0 %v2754_v50 }
 0x87d   : > { %1939 = vmatprep.subr.bf16.mxu0 %v2355_v0  ;;  %1950 = vmatpush3.bf16.msra.mxu1 %v2787_v3 }
 0x87e   : > { %1951 = vmatprep.subr.bf16.mxu1 %v2355_v0 }
 0x880   : > { %1940 = vmatpush3.bf16.msra.mxu0 %v2759_v51 }
 0x881   : > { %1952 = vmatpush3.bf16.msra.mxu1 %v2791_v4  ;;  %1957 = vmatprep.subr.bf16.mxu0 %v2355_v0 }
 0x882   : > { %1969 = vmatprep.subr.bf16.mxu1 %v2355_v0 }
 0x946   : > { %v1130_v62 = vpop.f32.mrb[20].mxu0  ;;  %v1170_v63 = vpop.f32.mrb[20].mxu1 }
 0x947   : > { %v1176_v1 = vsel %vm609_vm5, %v1130_v62, %v1170_v63  ;;  %v1925_v2 = vpop.f32.mrb[21].mxu0  ;;  %v1931_v9 = vpop.f32.mrb[21].mxu1 }
 0x948   : > { %v1177_v10 = vpack.c.bf16 %v1176_v1, %v1176_v1  ;;  %v1133_v11 = vpop.f32.mrb[22].mxu0  ;;  %v1173_v12 = vpop.f32.mrb[22].mxu1 }
 0x949   : > { %v1926_v13 = vpop.f32.mrb[23].mxu0  ;;  %v1932_v14 = vpop.f32.mrb[23].mxu1 }
 0x94a   : > { %1942 = vmatmul.mubr.msk.bf16.vlgmr.msra.gmra.mrb[24].mxu0 %vm639_vm2, %v1177_v10 }
 0x94b   : > { %1958 = vmatpush3.bf16.msra.mxu0 %v2667_v6  ;;  %1965 = vmatprep.mubr.msk.bf16.mxu0 %vm2356_vm0, %v2355_v0 }
 0x94c   : > { %1959 = vmatprep.subr.bf16.mxu0 %v2355_v0 }
 0x94f   : > { %1960 = vmatpush3.bf16.msra.mxu0 %v2670_v7 }
 0x950   : > { %1961 = vmatprep.subr.bf16.mxu0 %v2355_v0 }
 0x953   : > { %1962 = vmatpush3.bf16.msra.mxu0 %v2674_v8 }
 0x954   : > { %1963 = vmatprep.subr.bf16.mxu0 %v2355_v0 }
 0x957   : > { %1964 = vmatpush3.bf16.msra.mxu0 %v2685_v17 }
 0x958   : > { %1981 = vmatprep.subr.bf16.mxu0 %v2355_v0 }
 0xa1d   : > { %v1215_v15 = vpop.f32.mrb[24].mxu0 }
 0xa1e   : > { %v1216_v6 = vadd.f32 %v2798_v5, %v1215_v15  ;;  %v1943_v16 = vpop.f32.mrb[25].mxu0 }
 0xa1f   : > { %v1218_v20 = vpop.f32.mrb[26].mxu0 }
 0xa20   : > { %v1221_v21 = vmax.f32 %v1216_v6, 0.0  ;;  %v1944_v24 = vpop.f32.mrb[27].mxu0 }
 0xa22   : > { %v1222_v25 = vpack.c.bf16 %v1221_v21, %v1221_v21 }
 0xa24   : > { %1954 = vmatmul.mubr.msk.bf16.vlgmr.msra.gmra.mrb[24].mxu1 %vm639_vm2, %v1222_v25 }
 0xa25   : > { %1970 = vmatpush3.bf16.msra.mxu1 %v2689_v18  ;;  %1977 = vmatprep.mubr.msk.bf16.mxu1 %vm2356_vm0, %v2355_v0 }
 0xa26   : > { %1971 = vmatprep.subr.bf16.mxu1 %v2355_v0 }
 0xa29   : > { %1972 = vmatpush3.bf16.msra.mxu1 %v2692_v19 }
 0xa2a   : > { %1973 = vmatprep.subr.bf16.mxu1 %v2355_v0 }
 0xa2d   : > { %1974 = vmatpush3.bf16.msra.mxu1 %v2707_v27 }
 0xa2e   : > { %1975 = vmatprep.subr.bf16.mxu1 %v2355_v0 }
 0xa31   : > { %1976 = vmatpush3.bf16.msra.mxu1 %v2711_v28 }
 0xa32   : > { %1987 = vmatprep.subr.bf16.mxu1 %v2355_v0 }
 0xaf7   : > { %v1260_v7 = vpop.f32.mrb[24].mxu1 }
 0xaf8   : > { %v1261_v8 = vadd.f32 %v2817_v23, %v1260_v7  ;;  %v1955_v17 = vpop.f32.mrb[25].mxu1 }
 0xaf9   : > { %v1263_v18 = vpop.f32.mrb[26].mxu1 }
 0xafa   : > { %v1266_v26 = vmax.f32 %v1261_v8, 0.0  ;;  %v1956_v32 = vpop.f32.mrb[27].mxu1 }
 0xafc   : > { %v1267_v33 = vmul.f32 %v2821_v31, %v1266_v26 }
 0xafe   : > { %v1268_v19 = vadd.f32 %v1267_v33, %v2700_v22 }
 0xb00   : > { %v1269_v34 = vpack.c.bf16 %v1268_v19, %v1268_v19 }
 0xb02   : > { %1966 = vmatmul.mubr.msk.bf16.vlgmr.msra.gmra.mrb[28].mxu0 %vm639_vm2, %v1269_v34 }
 0xb03   : > { %1983 = vmatprep.mubr.msk.bf16.mxu0 %vm2356_vm0, %v2355_v0 }
 0xbd5   : > { %v1307_v27 = vpop.f32.mrb[28].mxu0 }
 0xbd6   : > { %v1308_v28 = vadd.f32 %v2722_v30, %v1307_v27  ;;  %v1967_v35 = vpop.f32.mrb[29].mxu0 }
 0xbd7   : > { %v1310_v36 = vpop.f32.mrb[30].mxu0 }
 0xbd8   : > { %v1313_v37 = vmax.f32 %v1308_v28, 0.0  ;;  %v1968_v39 = vpop.f32.mrb[31].mxu0 }
 0xbda   : > { %v1314_v40 = vpack.c.bf16 %v1313_v37, %v1313_v37 }
 0xbdc   : > { %1978 = vmatmul.mubr.msk.bf16.vlgmr.msra.gmra.mrb[28].mxu1 %vm639_vm2, %v1314_v40 }
 0xbdd   : > { %1989 = vmatprep.mubr.msk.bf16.mxu1 %vm2356_vm0, %v2355_v0 }
 0xcaf   : > { %v1352_v41 = vpop.f32.mrb[28].mxu1 }
 0xcb0   : > { %v1353_v42 = vadd.f32 %v2731_v38, %v1352_v41  ;;  %v1979_v43 = vpop.f32.mrb[29].mxu1 }
 0xcb1   : > { %v1355_v44 = vpop.f32.mrb[30].mxu1 }
 0xcb2   : > { %v1358_v45 = vmax.f32 %v1353_v42, 0.0  ;;  %v1980_v46 = vpop.f32.mrb[31].mxu1 }
 0xcb4   : > { %v1359_v54 = vpack.c.bf16 %v1358_v45, %v1358_v45 }
 0xcb6   : > { %v1361_v30 = vsel %vm774_vm3, %v1359_v54, 0 }
 0xcb7   : > { %1982 = vmatpush3.bf16.msra.mxu0 %v1361_v30  ;;  %1988 = vmatpush3.bf16.msra.mxu1 %v1361_v30 }
 0xcb8   : > { %1993 = vmatprep.subr.bf16.mxu0 %v2355_v0  ;;  %2005 = vmatprep.subr.bf16.mxu1 %v2355_v0 }
 0xcba   : > { %1984 = vmatmul.mubr.msk.bf16.vlgmr.msra.gmra.mrb[32].mxu0 %vm770_vm4, %v2735_v47  ;;  %1990 = vmatmul.mubr.msk.bf16.vlgmr.msra.gmra.mrb[32].mxu1 %vm770_vm4, %v2716_v29 }
 0xcbb   : > { %1994 = vmatpush3.bf16.msra.mxu0 %v2737_v48  ;;  %2001 = vmatprep.mubr.msk.bf16.mxu0 %vm2356_vm0, %v2355_v0 }
 0xcbc   : > { %1995 = vmatprep.subr.bf16.mxu0 %v2355_v0  ;;  %2006 = vmatpush3.bf16.msra.mxu1 %v2763_v52 }
 0xcbd   : > { %2007 = vmatprep.subr.bf16.mxu1 %v2355_v0  ;;  %2013 = vmatprep.mubr.msk.bf16.mxu1 %vm2356_vm0, %v2355_v0 }
 0xcbf   : > { %1996 = vmatpush3.bf16.msra.mxu0 %v2746_v49 }
 0xcc0   : > { %1997 = vmatprep.subr.bf16.mxu0 %v2355_v0  ;;  %2008 = vmatpush3.bf16.msra.mxu1 %v2766_v53 }
 0xcc1   : > { %2009 = vmatprep.subr.bf16.mxu1 %v2355_v0 }
 0xcc3   : > { %1998 = vmatpush3.bf16.msra.mxu0 %v2754_v50 }
 0xcc4   : > { %1999 = vmatprep.subr.bf16.mxu0 %v2355_v0  ;;  %2010 = vmatpush3.bf16.msra.mxu1 %v2787_v3 }
 0xcc5   : > { %2011 = vmatprep.subr.bf16.mxu1 %v2355_v0 }
 0xcc7   : > { %2000 = vmatpush3.bf16.msra.mxu0 %v2759_v51 }
 0xcc8   : > { %2012 = vmatpush3.bf16.msra.mxu1 %v2791_v4 }
 0xd8d   : > { %v1397_v29 = vpop.f32.mrb[32].mxu0  ;;  %v1437_v38 = vpop.f32.mrb[32].mxu1 }
 0xd8e   : > { %v1443_v47 = vsel %vm609_vm5, %v1397_v29, %v1437_v38  ;;  %v1985_v48 = vpop.f32.mrb[33].mxu0  ;;  %v1991_v49 = vpop.f32.mrb[33].mxu1 }
 0xd8f   : > { %v1444_v52 = vpack.c.bf16 %v1443_v47, %v1443_v47  ;;  %v1400_v50 = vpop.f32.mrb[34].mxu0  ;;  %v1440_v53 = vpop.f32.mrb[34].mxu1 }
 0xd90   : > { %v1986_v56 = vpop.f32.mrb[35].mxu0  ;;  %v1992_v57 = vpop.f32.mrb[35].mxu1 }
 0xd91   : > { %2002 = vmatmul.mubr.msk.bf16.vlgmr.msra.gmra.mrb[36].mxu0 %vm639_vm2, %v1444_v52 }
 0xe64   : > { %v1482_v0 = vpop.f32.mrb[36].mxu0 }
 0xe65   : > { %v1483_v51 = vadd.f32 %v2798_v5, %v1482_v0  ;;  %v2003_v3 = vpop.f32.mrb[37].mxu0 }
 0xe66   : > { %v1485_v4 = vpop.f32.mrb[38].mxu0 }
 0xe67   : > { %v1488_v58 = vmax.f32 %v1483_v51, 0.0  ;;  %v2004_v59 = vpop.f32.mrb[39].mxu0 }
 0xe69   : > { %v1489_v55 = vpack.c.bf16 %v1488_v58, %v1488_v58 }
 0xe6b   : > { %2014 = vmatmul.mubr.msk.bf16.vlgmr.msra.gmra.mrb[36].mxu1 %vm639_vm2, %v1489_v55 }
 0xf3e   : > { %v1527_v60 = vpop.f32.mrb[36].mxu1 }
 0xf3f   : > { %v1528_v61 = vadd.f32 %v2817_v23, %v1527_v60  ;;  %v2015_v62 = vpop.f32.mrb[37].mxu1 }
 0xf40   : > { %v1530_v63 = vpop.f32.mrb[38].mxu1 }
 0xf41   : > { %v1533_v1 = vmax.f32 %v1528_v61, 0.0  ;;  %v2016_v2 = vpop.f32.mrb[39].mxu1 }
 0xf43   : > { %v1534_v5 = vmul.f32 %v2821_v31, %v1533_v1 }
 0xf45   : > { %v1535_v9 = vadd.f32 %v1534_v5, %v2700_v22 }
 0xf47   : > { %1536 = vst.msk [vmem:[%s400_s15] sm:$0xff] %vm639_vm2, %v1535_v9 }
 0xf48   : > { %2281 = shalt.err (!%p2278_p6)
}
 0xf49   : > { %s2282_s2 = scalar_lea.hbm %s2934_s27, 128  ;;  %s2286_s10 = scalar_lea.hbm %s2986_s8, 512 }
 0xf4a   : > { %p2283_p12 = scmp.ne.s32.totalorder %s2934_s27, %s2282_s2  ;;  %p2287_p10 = scmp.lt.u32.totalorder %s2934_s27, %s2986_s8 }
 0xf4b   : > { %p2288_p3 = scmp.lt.u32.totalorder %s2286_s10, %s2282_s2  ;;  %p2290_p11 = scmp.lt.u32.totalorder %s2282_s2, %s2934_s27 }
 0xf4c   : > { %p2284_p9 = pnand %p2283_p12, %p3015_p1 }
 0xf4d   : > { %p2289_p7 = por %p2288_p3, %p2287_p10 }
 0xf4e   : > { %p2285_p5 = pneg %p2284_p9 }
 0xf4f   : > { %p2291_p2 = por %p2290_p11, %p2289_p7 }
 0xf51   : > { %p2292_p4 = pnand %p2291_p2, %p2285_p5 }
 0xf53   : > { %2295 = shalt.err (!%p2292_p4)
}
 0xf54   : > { %2033 = dma.vmem_to_hbm [thread:$0]  (%p3015_p1), %s2936_s16, 128, %s2934_s27, %s1538_s19  }
 0xf55 PF: > { %s3016_s6 = sld [smem:[#allocation17_spill]]  ;;  %s3017_s21 = sld [smem:[#allocation18_spill]] }
 0xf56   : > { %p2063_p13 = scmp.ge.s32.totalorder %s2346_s30, 2 }
 0xf5b   : > { %s1563_s14 = sand.u32 1, %s3016_s6   ;;  %p3018_p8 = scmp.ne.s32.totalorder %s3017_s21, 0 }
 0xf5c   : > { %s1564_s15 = scalar_lea.sflag [#allocation4], %s1563_s14 }
 0xf5d   : > { %p2053_p0 = pnand %p2063_p13, %p3018_p8 }
 0xf5f   : > { %2329 = dma.done.wait (!%p2053_p0), %s1564_s15, 128  }
 0xf60   : > { %2331 = vsyncadd (!%p2053_p0), %s1564_s15, 4294967168  ;;  %p25_p6 = scmp.ge.s32.totalorder %s2543_s26, 6   ;;  %s3019_s27 = smov %s2338_s28 }
 0xf61   : > { %s3020_s28 = smov %s2342_s29  ;;  %s3021_s29 = smov %s2553_s22 }
 0xf62   : > { %s3022_s30 = smov %s2543_s26  ;;  %27 = sbr.rel (!%p25_p6) target bundleno = 12 (0xc), region = 128 }
 0xf69   :  { %1569 = vsyncpa [#allocation3], 1 }
 0xf6a   :  { %1571 = vsyncpa [#allocation3 + $0x1], 1 }
 0xf6b   :  { %1572 = vsyncpa [#allocation6], 1 }
 0xf6c   :  { %1574 = vsyncpa [#allocation6 + $0x1], 1 }
 0xf6d   :  { %1575 = vsyncpa [#allocation9], 1 }
 0xf6e   :  { %1576 = vsyncpa [#allocation4], 1 }
 0xf6f   :  { %1578 = vsyncpa [#allocation4 + $0x1], 1 }

</bundles_post_ra>
